<compile_context>
chip_gen: v5e
topology: v5e:2x2
jax: 0.10.0
libtpu: 0.0.40
codegen_flags: <defaults>
</compile_context>

<pallas_src>
import functools

import jax
import jax.numpy as jnp
from jax.experimental import pallas as pl
from jax.experimental.pallas import tpu as pltpu

LANE = 128
SUBLANE = 8


def _round_up(x, m):
    return (x + m - 1) // m * m


# ----------------------------------------------------------------------------
# Fused kernel: whole MLP on one batch tile, all weights resident in VMEM.
# ----------------------------------------------------------------------------
def _mlp_fused_kernel(x_ref, w_ref, b_ref, o_ref, *, n_layers, d_in_k, d_out):
    """h = x; for each layer: h = relu?(h @ W[i] + b[i]); store d_out lanes."""
    h = x_ref[...].astype(jnp.float32)                        # (TM, d_in_k) f32
    for i in range(n_layers):                                 # static unroll
        # Layer 0 contracts over the real (granule-rounded) input width only;
        # later layers use the full padded square weight tile (padded lanes of
        # h are exactly zero, so the extra contraction terms are inert).
        w = w_ref[0, :d_in_k, :] if i == 0 else w_ref[i]
        y = jnp.dot(h.astype(w_ref.dtype), w,
                    preferred_element_type=jnp.float32)       # (TM, D_PAD) f32
        y = y + b_ref[i]                                      # (1, D_PAD) bcast
        if i < n_layers - 1:
            y = jnp.maximum(y, 0.0)                           # ReLU
        h = y
    o_ref[...] = h[:, :d_out].astype(o_ref.dtype)             # real-width store


# ----------------------------------------------------------------------------
# Host-side wrapper
# ----------------------------------------------------------------------------
def mlp_forward(x, w_stack, b_stack, dims, *, block_m=512):
    """x: (batch, dims[0]) -> (batch, dims[-1]).

    w_stack: (L, D_PAD, D_PAD) zero-padded weights stored as (in, out), bf16.
    b_stack: (L, 1, D_PAD)     zero-padded biases, f32.
    """
    n, d_in = x.shape
    n_layers, d_pad, _ = w_stack.shape
    d_out = dims[-1]

    # Batch tile: multiple of the 8-row sublane granule, capped at block_m,
    # chosen so the grid has >= 4 steps when the batch allows (keeps both v7x
    # TensorCores and the double-buffer pipeline busy).
    n_sub = _round_up(n, SUBLANE)
    tm = max(SUBLANE, min(block_m, _round_up(pl.cdiv(n_sub, 4), SUBLANE)))
    n_pad = _round_up(n_sub, tm)
    grid = n_pad // tm

    # Layer-0 contraction width: real input width rounded to the weight-dtype
    # sublane granule (bf16 packs 16 rows per sublane tile, f32 packs 8).
    w_itemsize = jnp.dtype(w_stack.dtype).itemsize
    k_granule = SUBLANE * max(1, 4 // w_itemsize)
    d_in_k = min(_round_up(d_in, k_granule), d_pad)

    # Only pad batch rows / input lanes when actually required (no 128-lane
    # host-side pad, no extra HBM round trip in the common aligned case).
    if (n_pad, d_in_k) != (n, d_in):
        x_p = jnp.zeros((n_pad, d_in_k), x.dtype).at[:n, :d_in].set(x)
    else:
        x_p = x

    kernel = functools.partial(_mlp_fused_kernel, n_layers=n_layers,
                               d_in_k=d_in_k, d_out=d_out)

    # Advisory cost model with real (unpadded) flop / byte counts.
    flops = 2 * n * sum(dims[i] * dims[i + 1] for i in range(n_layers))
    bytes_accessed = (x.size * x.dtype.itemsize
                      + w_stack.size * w_itemsize
                      + b_stack.size * b_stack.dtype.itemsize
                      + n * d_out * x.dtype.itemsize)

    # VMEM budget: resident weights/biases (single-buffered) + streamed tiles,
    # with 2x headroom; 32 MiB floor / 48 MiB cap is safe on v5e/v6e/v7x.
    resident = (w_stack.size * w_itemsize
                + b_stack.size * b_stack.dtype.itemsize)
    streamed = 2 * tm * (d_in_k + d_pad + d_out) * 4
    vmem_limit = int(min(48 * 2**20, max(32 * 2**20, 2 * (resident + streamed))))

    out_p = pl.pallas_call(
        kernel,
        out_shape=jax.ShapeDtypeStruct((n_pad, d_out), x.dtype),
        grid=(grid,),
        in_specs=[
            # Batch-tiled activations at their real width (double-buffered).
            pl.BlockSpec((tm, d_in_k), lambda i: (i, 0)),
            # Weights & biases: constant block index -> DMA'd once, resident,
            # single-buffered (a second buffer would be pure VMEM waste).
            pl.BlockSpec((n_layers, d_pad, d_pad), lambda i: (0, 0, 0),
                         pipeline_mode=pl.Buffered(1)),
            pl.BlockSpec((n_layers, 1, d_pad), lambda i: (0, 0, 0),
                         pipeline_mode=pl.Buffered(1)),
        ],
        out_specs=pl.BlockSpec((tm, d_out), lambda i: (i, 0)),
        compiler_params=pltpu.CompilerParams(
            # Independent batch tiles -> shard across TensorCores on v7x.
            dimension_semantics=("parallel",),
            vmem_limit_bytes=vmem_limit,
        ),
        cost_estimate=pl.CostEstimate(flops=flops, transcendentals=0,
                                      bytes_accessed=bytes_accessed),
    )(x_p, w_stack, b_stack)

    return out_p if n_pad == n else out_p[:n]


# ----------------------------------------------------------------------------
# Parameter construction / packing
# ----------------------------------------------------------------------------
def init_mlp_params(key, dims):
    """nn.Linear-style init (uniform +/- 1/sqrt(fan_in)); W stored (in, out)."""
    params = []
    for i in range(len(dims) - 1):
        d_i, d_o = dims[i], dims[i + 1]
        key, kw, kb = jax.random.split(key, 3)
        bound = 1.0 / jnp.sqrt(jnp.float32(d_i))
        w = jax.random.uniform(kw, (d_i, d_o), jnp.float32, -bound, bound)
        b = jax.random.uniform(kb, (d_o,), jnp.float32, -bound, bound)
        params.append((w, b))
    return params


def pack_mlp_params(params, dims, d_pad, dtype=jnp.bfloat16):
    """Zero-pad every layer to (d_pad, d_pad) and stack; pack all biases."""
    n_layers = len(params)
    w_stack = jnp.zeros((n_layers, d_pad, d_pad), dtype)
    b_stack = jnp.zeros((n_layers, 1, d_pad), jnp.float32)
    for i, (w, b) in enumerate(params):
        d_i, d_o = dims[i], dims[i + 1]
        w_stack = w_stack.at[i, :d_i, :d_o].set(w.astype(dtype))
        b_stack = b_stack.at[i, 0, :d_o].set(b)
    return w_stack, b_stack


# ----------------------------------------------------------------------------
# References
# ----------------------------------------------------------------------------
def mlp_reference(x, params):
    """Pure-JAX f32 reference on the original (unpadded) parameters."""
    n_layers = len(params)
    for i, (w, b) in enumerate(params):
        x = x @ w + b
        if i < n_layers - 1:
            x = jnp.maximum(x, 0.0)
    return x


def mlp_reference_quantized(x, params, w_dtype):
    """Same numerics as the kernel: bf16 weights/activations, f32 accumulate."""
    n_layers = len(params)
    h = x.astype(jnp.float32)
    for i, (w, b) in enumerate(params):
        h = jnp.dot(h.astype(w_dtype), w.astype(w_dtype),
                    preferred_element_type=jnp.float32) + b
        if i < n_layers - 1:
            h = jnp.maximum(h, 0.0)
    return h


if __name__ == "__main__":
    dims = [32, 64, 48, 16]     # MLP([32, 64, 48, 16], act='relu')
    batch = 256                 # gives a 4-step batch grid

    key = jax.random.PRNGKey(0)
    key, kx = jax.random.split(key)
    x = jax.random.normal(kx, (batch, dims[0]), jnp.float32)
    params = init_mlp_params(key, dims)

    # Common 128-lane-aligned width for all layers; weights stored bf16.
    d_pad = max(_round_up(d, LANE) for d in dims)
    w_stack, b_stack = pack_mlp_params(params, dims, d_pad, dtype=jnp.bfloat16)

    out = mlp_forward(x, w_stack, b_stack, dims, block_m=512)
    out = jax.block_until_ready(out)
    assert out.shape == (batch, dims[-1])

    # Kernel correctness vs. a reference using identical bf16/f32-acc numerics.
    ref_q = mlp_reference_quantized(x, params, jnp.bfloat16)
    assert jnp.allclose(out, ref_q, atol=2e-3, rtol=2e-3), float(
        jnp.max(jnp.abs(out - ref_q)))

    # Semantic sanity vs. full-precision module (loose: bf16 weight storage).
    ref = mlp_reference(x, params)
    assert jnp.allclose(out, ref, atol=1.5e-1, rtol=1e-1), float(
        jnp.max(jnp.abs(out - ref)))

    print("KERNEL_OK")
</pallas_src>

<mosaic_0001>
module attributes {stable_mosaic.version = 11 : i64} {
  func.func @_mlp_fused_kernel(%arg0: i32, %arg1: memref<64x32xf32, #tpu.memory_space<vmem>>, %arg2: memref<3x128x128xbf16, #tpu.memory_space<vmem>>, %arg3: memref<3x1x128xf32, #tpu.memory_space<vmem>>, %arg4: memref<64x16xf32, #tpu.memory_space<vmem>>) attributes {dimension_semantics = [#tpu.dimension_semantics<parallel>], iteration_bounds = array<i64: 4>, scalar_prefetch = 0 : i64, scratch_operands = 0 : i64, tpu.core_type = #tpu.core_type<tc>, window_params = [{transform_indices = @transform_0, window_bounds = array<i64: 64, 32>}, {pipeline_mode = #tpu.pipeline_mode<synchronous>, transform_indices = @transform_1, window_bounds = array<i64: 3, 128, 128>}, {pipeline_mode = #tpu.pipeline_mode<synchronous>, transform_indices = @transform_2, window_bounds = array<i64: 3, 1, 128>}, {transform_indices = @transform_3, window_bounds = array<i64: 64, 16>}]} {
    %c0 = arith.constant 0 : index
    %c0_0 = arith.constant 0 : index
    %0 = vector.load %arg1[%c0, %c0_0] : memref<64x32xf32, #tpu.memory_space<vmem>>, vector<64x32xf32>
    %c0_1 = arith.constant 0 : index
    %c0_2 = arith.constant 0 : index
    %c0_3 = arith.constant 0 : index
    %1 = vector.load %arg2[%c0_1, %c0_2, %c0_3] : memref<3x128x128xbf16, #tpu.memory_space<vmem>>, vector<1x32x128xbf16>
    %2 = vector.shape_cast %1 : vector<1x32x128xbf16> to vector<32x128xbf16>
    %3 = arith.truncf %0 : vector<64x32xf32> to vector<64x32xbf16>
    %cst = arith.constant dense<0.000000e+00> : vector<64x128xf32>
    %4 = tpu.matmul %3, %2, %cst {dimension_numbers = #tpu.dot_dimension_numbers<[1], [0], [0], [1], [0, 0, 1, 1], [], []>} : vector<64x32xbf16>, vector<32x128xbf16>, vector<64x128xf32> -> vector<64x128xf32>
    %c0_4 = arith.constant 0 : index
    %c0_5 = arith.constant 0 : index
    %c0_6 = arith.constant 0 : index
    %5 = vector.load %arg3[%c0_4, %c0_5, %c0_6] : memref<3x1x128xf32, #tpu.memory_space<vmem>>, vector<1x1x128xf32>
    %6 = vector.shape_cast %5 : vector<1x1x128xf32> to vector<1x128xf32>
    %7 = vector.broadcast %6 : vector<1x128xf32> to vector<64x128xf32>
    %8 = arith.addf %4, %7 : vector<64x128xf32>
    %cst_7 = arith.constant 0.000000e+00 : f32
    %9 = vector.broadcast %cst_7 : f32 to vector<64x128xf32>
    %10 = arith.maximumf %8, %9 : vector<64x128xf32>
    %c1 = arith.constant 1 : index
    %c0_8 = arith.constant 0 : index
    %c0_9 = arith.constant 0 : index
    %11 = vector.load %arg2[%c1, %c0_8, %c0_9] : memref<3x128x128xbf16, #tpu.memory_space<vmem>>, vector<1x128x128xbf16>
    %12 = vector.shape_cast %11 : vector<1x128x128xbf16> to vector<128x128xbf16>
    %13 = arith.truncf %10 : vector<64x128xf32> to vector<64x128xbf16>
    %cst_10 = arith.constant dense<0.000000e+00> : vector<64x128xf32>
    %14 = tpu.matmul %13, %12, %cst_10 {dimension_numbers = #tpu.dot_dimension_numbers<[1], [0], [0], [1], [0, 0, 1, 1], [], []>} : vector<64x128xbf16>, vector<128x128xbf16>, vector<64x128xf32> -> vector<64x128xf32>
    %c1_11 = arith.constant 1 : index
    %c0_12 = arith.constant 0 : index
    %c0_13 = arith.constant 0 : index
    %15 = vector.load %arg3[%c1_11, %c0_12, %c0_13] : memref<3x1x128xf32, #tpu.memory_space<vmem>>, vector<1x1x128xf32>
    %16 = vector.shape_cast %15 : vector<1x1x128xf32> to vector<1x128xf32>
    %17 = vector.broadcast %16 : vector<1x128xf32> to vector<64x128xf32>
    %18 = arith.addf %14, %17 : vector<64x128xf32>
    %cst_14 = arith.constant 0.000000e+00 : f32
    %19 = vector.broadcast %cst_14 : f32 to vector<64x128xf32>
    %20 = arith.maximumf %18, %19 : vector<64x128xf32>
    %c2 = arith.constant 2 : index
    %c0_15 = arith.constant 0 : index
    %c0_16 = arith.constant 0 : index
    %21 = vector.load %arg2[%c2, %c0_15, %c0_16] : memref<3x128x128xbf16, #tpu.memory_space<vmem>>, vector<1x128x128xbf16>
    %22 = vector.shape_cast %21 : vector<1x128x128xbf16> to vector<128x128xbf16>
    %23 = arith.truncf %20 : vector<64x128xf32> to vector<64x128xbf16>
    %cst_17 = arith.constant dense<0.000000e+00> : vector<64x128xf32>
    %24 = tpu.matmul %23, %22, %cst_17 {dimension_numbers = #tpu.dot_dimension_numbers<[1], [0], [0], [1], [0, 0, 1, 1], [], []>} : vector<64x128xbf16>, vector<128x128xbf16>, vector<64x128xf32> -> vector<64x128xf32>
    %c2_18 = arith.constant 2 : index
    %c0_19 = arith.constant 0 : index
    %c0_20 = arith.constant 0 : index
    %25 = vector.load %arg3[%c2_18, %c0_19, %c0_20] : memref<3x1x128xf32, #tpu.memory_space<vmem>>, vector<1x1x128xf32>
    %26 = vector.shape_cast %25 : vector<1x1x128xf32> to vector<1x128xf32>
    %27 = vector.broadcast %26 : vector<1x128xf32> to vector<64x128xf32>
    %28 = arith.addf %24, %27 : vector<64x128xf32>
    %29 = vector.extract_strided_slice %28 {offsets = [0, 0], sizes = [64, 16], strides = [1, 1]} : vector<64x128xf32> to vector<64x16xf32>
    %c0_21 = arith.constant 0 : index
    %c0_22 = arith.constant 0 : index
    %30 = vector.load %arg4[%c0_21, %c0_22] : memref<64x16xf32, #tpu.memory_space<vmem>>, vector<64x16xf32>
    tpu.vector_store %arg4[%c0_21, %c0_22], %29 {strides = array<i32>} : memref<64x16xf32, #tpu.memory_space<vmem>>, vector<64x16xf32>,
    return
  }
  func.func @transform_0(%arg0: i32) -> (i32, i32) {
    %c0_i32 = arith.constant 0 : i32
    %c0_i32_0 = arith.constant 0 : i32
    return %arg0, %c0_i32 : i32, i32
  }
  func.func @transform_1(%arg0: i32) -> (i32, i32, i32) {
    %c0_i32 = arith.constant 0 : i32
    %c0_i32_0 = arith.constant 0 : i32
    %c0_i32_1 = arith.constant 0 : i32
    %c0_i32_2 = arith.constant 0 : i32
    return %c0_i32, %c0_i32_0, %c0_i32_1 : i32, i32, i32
  }
  func.func @transform_2(%arg0: i32) -> (i32, i32, i32) {
    %c0_i32 = arith.constant 0 : i32
    %c0_i32_0 = arith.constant 0 : i32
    %c0_i32_1 = arith.constant 0 : i32
    %c0_i32_2 = arith.constant 0 : i32
    return %c0_i32, %c0_i32_0, %c0_i32_1 : i32, i32, i32
  }
  func.func @transform_3(%arg0: i32) -> (i32, i32) {
    %c0_i32 = arith.constant 0 : i32
    %c0_i32_0 = arith.constant 0 : i32
    return %arg0, %c0_i32 : i32, i32
  }
}

</mosaic_0001>

<bundles_post_ra>
// kernel: tpu_custom_call.1
= control target key start
LH: loop header
LB: loop body
LE: loop exit
PB: predicated region body
PF: predicated region fallthrough
CT: control target
= control target key end

     0   :  { %s730_s12 = smov 0   ;;  %s829_s0 = inlined_call_operand.vmem [shape: f32[256,32], index: 0, kind: input, shape index: {}]   ;;  %s830_s1 = inlined_call_operand.vmem [shape: bf16[3,128,128], index: 1, kind: input, shape index: {}]   ;;  %s831_s2 = inlined_call_operand.vmem [shape: f32[3,1,128], index: 2, kind: input, shape index: {}]   ;;  %s832_s3 = inlined_call_operand.vmem [shape: f32[256,16], index: 3, kind: output, shape index: {}]  }
   0x1 LB: > { %s536_s13 = sadd.s32 4294967295, %s708_s12   ;;  %p540_p0 = scmp.ge.s32.totalorder %s708_s12, 1  ;;  %s708_s12 = sphi %s730_s12, %s13_s12  }
   0x2   : > { %p138_p1 = scmp.lt.s32.totalorder %s708_s12, 5 }
   0x4   : > { %p139_p2 = pnand %p540_p0, %p138_p1 }
   0x5   : > { %s541_s16 = sshll.u32 (!%p139_p2), %s536_s13, 3 }
   0x6   : > { %142 = sbr.rel (%p139_p2) target bundleno = 496 (0x1f0), region = 32  ;;  %p163_p3 = scmp.lt.s32.totalorder (!%p139_p2), %s541_s16, 31 }
   0xb   : > { %v658_v0 = vld [vmem:[%s830_s1 + $0x8] sm:$0xff]  ;;  %v657_v1 = vld [vmem:[%s830_s1] sm:$0xff]  ;;  %s834_s16 = smov (!%p163_p3, %s541_s16), 31  ;;  %vm207_vm0 = vcmask 261120   ;;  %v666_v8 = vld [vmem:[%s830_s1 + $0x78] sm:$0xff]  ;;  %vm471_vm1 = vcmask 130048  }
   0xc   : > { %226 = vmatpush.bf16.msra.mxu0 %v658_v0  ;;  %s542_s19 = sshll.u32 %s834_s16, 3  ;;  %331 = vmatpush.bf16.msra.mxu1 %v666_v8  ;;  %v665_v9 = vld [vmem:[%s830_s1 + $0x70] sm:$0xff]  ;;  %v664_v10 = vld [vmem:[%s830_s1 + $0x68] sm:$0xff]  ;;  %v663_v13 = vld [vmem:[%s830_s1 + $0x60] sm:$0xff] }
   0xd   : > { %s166_s22 = scalar_lea.vmem %s829_s0, %s542_s19  ;;  %675 = vmatpush.bf16.msra.mxu3 %v666_v8  ;;  %v662_v18 = vld [vmem:[%s830_s1 + $0x58] sm:$0xff]  ;;  %v661_v19 = vld [vmem:[%s830_s1 + $0x50] sm:$0xff]  ;;  %v660_v20 = vld [vmem:[%s830_s1 + $0x48] sm:$0xff]  ;;  %s172_s13 = scalar_lea.vmem %s832_s3, %s542_s19 }
   0xe   : > { %v175_v2 = vld [vmem:[%s166_s22] sm:$0xff]  ;;  %v176_v3 = vld [vmem:[%s166_s22 + $0x8] sm:$0xff]  ;;  %v177_v5 = vld [vmem:[%s166_s22 + $0x10] sm:$0xff] }
   0xf   : > { %v187_v4 = vpack.c.bf16 %v176_v3, %v175_v2  ;;  %v178_v6 = vld [vmem:[%s166_s22 + $0x18] sm:$0xff]  ;;  %v179_v11 = vld [vmem:[%s166_s22 + $0x20] sm:$0xff]  ;;  %v180_v12 = vld [vmem:[%s166_s22 + $0x28] sm:$0xff] }
  0x10   : > { %227 = vmatpush.bf16.msra.mxu0 %v657_v1  ;;  %v188_v7 = vpack.c.bf16 %v178_v6, %v177_v5  ;;  %332 = vmatpush.bf16.msra.mxu1 %v665_v9  ;;  %v189_v14 = vpack.c.bf16 %v180_v12, %v179_v11  ;;  %v181_v15 = vld [vmem:[%s166_s22 + $0x30] sm:$0xff]  ;;  %v182_v16 = vld [vmem:[%s166_s22 + $0x38] sm:$0xff]  ;;  %v659_v21 = vld [vmem:[%s830_s1 + $0x40] sm:$0xff] }
  0x11   : > { %676 = vmatpush.bf16.msra.mxu3 %v665_v9  ;;  %v190_v17 = vpack.c.bf16 %v182_v16, %v181_v15  ;;  %v699_v23 = vld [vmem:[%s831_s2] ss:$0 sm:$0xff]  ;;  %v674_v37 = vld [vmem:[%s830_s1 + $0xb8] sm:$0xff]  ;;  %v673_v39 = vld [vmem:[%s830_s1 + $0xb0] sm:$0xff] }
  0x12   : > { %683 = vmatpush.bf16.msra.mxu2 %v674_v37  ;;  %v672_v40 = vld [vmem:[%s830_s1 + $0xa8] sm:$0xff]  ;;  %v671_v44 = vld [vmem:[%s830_s1 + $0xa0] sm:$0xff]  ;;  %v670_v55 = vld [vmem:[%s830_s1 + $0x98] sm:$0xff] }
  0x13   : > { %553 = vmatmul.msk.bf16.vlgmr.msra.gmra.mxu0 %vm207_vm0, %v187_v4  ;;  %v669_v56 = vld [vmem:[%s830_s1 + $0x90] sm:$0xff]  ;;  %v668_v57 = vld [vmem:[%s830_s1 + $0x88] sm:$0xff]  ;;  %v667_v58 = vld [vmem:[%s830_s1 + $0x80] sm:$0xff] }
  0x14   : > { %333 = vmatpush.bf16.msra.mxu1 %v664_v10  ;;  %v700_v60 = vld [vmem:[%s831_s2 + $0x1] ss:$0 sm:$0xff] }
  0x15   : > { %677 = vmatpush.bf16.msra.mxu3 %v664_v10 }
  0x16   : > { %684 = vmatpush.bf16.msra.mxu2 %v673_v39 }
  0x18   : > { %334 = vmatpush.bf16.msra.mxu1 %v663_v13 }
  0x19   : > { %678 = vmatpush.bf16.msra.mxu3 %v663_v13 }
  0x1a   : > { %685 = vmatpush.bf16.msra.mxu2 %v672_v40 }
  0x1c   : > { %335 = vmatpush.bf16.msra.mxu1 %v662_v18 }
  0x1d   : > { %679 = vmatpush.bf16.msra.mxu3 %v662_v18 }
  0x1e   : > { %686 = vmatpush.bf16.msra.mxu2 %v671_v44 }
  0x20   : > { %336 = vmatpush.bf16.msra.mxu1 %v661_v19 }
  0x21   : > { %680 = vmatpush.bf16.msra.mxu3 %v661_v19 }
  0x22   : > { %687 = vmatpush.bf16.msra.mxu2 %v670_v55 }
  0x23   : > { %554 = vmatmul.msk.bf16.gmra.mxu0 %vm207_vm0, %v188_v7 }
  0x24   : > { %337 = vmatpush.bf16.msra.mxu1 %v660_v20 }
  0x25   : > { %681 = vmatpush.bf16.msra.mxu3 %v660_v20 }
  0x26   : > { %688 = vmatpush.bf16.msra.mxu2 %v669_v56 }
  0x28   : > { %338 = vmatpush.bf16.msra.mxu1 %v659_v21 }
  0x29   : > { %682 = vmatpush.bf16.msra.mxu3 %v659_v21 }
  0x2a   : > { %689 = vmatpush.bf16.msra.mxu2 %v668_v57 }
  0x2c   : > { %442 = vmatpush.bf16.msrb.mxu1 %v674_v37 }
  0x2e   : > { %690 = vmatpush.bf16.msra.mxu2 %v667_v58 }
  0x30   : > { %443 = vmatpush.bf16.msrb.mxu1 %v673_v39 }
  0x33   : > { %555 = vmatmul.msk.bf16.gmra.mxu0 %vm207_vm0, %v189_v14 }
  0x34   : > { %444 = vmatpush.bf16.msrb.mxu1 %v672_v40 }
  0x38   : > { %445 = vmatpush.bf16.msrb.mxu1 %v671_v44 }
  0x3c   : > { %446 = vmatpush.bf16.msrb.mxu1 %v670_v55 }
  0x40   : > { %447 = vmatpush.bf16.msrb.mxu1 %v669_v56 }
  0x43   : > { %556 = vmatmul.msk.bf16.gmra.mxu0 %vm207_vm0, %v190_v17 }
  0x44   : > { %448 = vmatpush.bf16.msrb.mxu1 %v668_v57 }
  0x48   : > { %449 = vmatpush.bf16.msrb.mxu1 %v667_v58 }
  0x90   : > { %v229_v22 = vpop.f32.mrf.mxu0 }
  0x91   : > { %v230_v24 = vadd.f32 %v699_v23, %v229_v22 }
  0x93   : > { %v249_v27 = vmax.f32 %v230_v24, 0.0  ;;  %v701_v24 = vld [vmem:[%s831_s2 + $0x2] ss:$0 sm:$0xff] }
  0x98   : > { %v231_v25 = vpop.f32.mrf.mxu0 }
  0x99   : > { %v232_v26 = vadd.f32 %v699_v23, %v231_v25 }
  0x9b   : > { %v250_v28 = vmax.f32 %v232_v26, 0.0 }
  0x9d   : > { %v274_v29 = vpack.c.bf16 %v250_v28, %v249_v27 }
  0x9f   : > { %339 = vmatmul.bf16.vlgmr.msra.gmra.mxu1 %v274_v29 }
  0xa0   : > { %v234_v30 = vpop.f32.mrf.mxu0 }
  0xa1   : > { %v235_v31 = vadd.f32 %v699_v23, %v234_v30 }
  0xa3   : > { %v251_v34 = vmax.f32 %v235_v31, 0.0 }
  0xa8   : > { %v236_v32 = vpop.f32.mrf.mxu0 }
  0xa9   : > { %v237_v33 = vadd.f32 %v699_v23, %v236_v32 }
  0xab   : > { %v252_v35 = vmax.f32 %v237_v33, 0.0 }
  0xad   : > { %v275_v36 = vpack.c.bf16 %v252_v35, %v251_v34 }
  0xaf   : > { %344 = vmatmul.bf16.vlgmr.msra.gmra.mxu3 %v275_v36 }
  0xb0   : > { %v239_v38 = vpop.f32.mrf.mxu0 }
  0xb1   : > { %v240_v41 = vadd.f32 %v699_v23, %v239_v38 }
  0xb3   : > { %v253_v45 = vmax.f32 %v240_v41, 0.0 }
  0xb8   : > { %v241_v42 = vpop.f32.mrf.mxu0 }
  0xb9   : > { %v242_v43 = vadd.f32 %v699_v23, %v241_v42 }
  0xbb   : > { %v254_v46 = vmax.f32 %v242_v43, 0.0 }
  0xbd   : > { %v276_v47 = vpack.c.bf16 %v254_v46, %v253_v45 }
  0xbf   : > { %349 = vmatmul.bf16.gmra.mxu3 %v276_v47 }
  0xc0   : > { %v244_v48 = vpop.f32.mrf.mxu0 }
  0xc1   : > { %v245_v49 = vadd.f32 %v699_v23, %v244_v48 }
  0xc3   : > { %v255_v52 = vmax.f32 %v245_v49, 0.0 }
  0xc8   : > { %v246_v50 = vpop.f32.mrf.mxu0 }
  0xc9   : > { %v247_v51 = vadd.f32 %v699_v23, %v246_v50 }
  0xcb   : > { %v256_v53 = vmax.f32 %v247_v51, 0.0 }
  0xcd   : > { %v277_v54 = vpack.c.bf16 %v256_v53, %v255_v52 }
  0xcf   : > { %354 = vmatmul.bf16.gmra.mxu3 %v277_v54 }
 0x11c   : > { %v340_v59 = vpop.f32.mrf.mxu1 }
 0x11d   : > { %v341_v61 = vadd.f32 %v700_v60, %v340_v59 }
 0x11f   : > { %v360_v0 = vmax.f32 %v341_v61, 0.0 }
 0x124   : > { %v342_v62 = vpop.f32.mrf.mxu1 }
 0x125   : > { %v343_v63 = vadd.f32 %v700_v60, %v342_v62 }
 0x127   : > { %v361_v1 = vmax.f32 %v343_v63, 0.0 }
 0x129   : > { %v385_v2 = vpack.c.bf16 %v361_v1, %v360_v0 }
 0x12b   : > { %450 = vmatmul.bf16.vlgmr.msrb.gmra.mxu1 %v385_v2 }
 0x132   : > { %v345_v3 = vpop.f32.mrf.mxu3 }
 0x133   : > { %v346_v4 = vadd.f32 %v700_v60, %v345_v3 }
 0x135   : > { %v362_v7 = vmax.f32 %v346_v4, 0.0 }
 0x13a   : > { %v347_v5 = vpop.f32.mrf.mxu3 }
 0x13b   : > { %v348_v6 = vadd.f32 %v700_v60, %v347_v5 }
 0x13d   : > { %v363_v8 = vmax.f32 %v348_v6, 0.0 }
 0x13f   : > { %v386_v9 = vpack.c.bf16 %v363_v8, %v362_v7 }
 0x141   : > { %455 = vmatmul.bf16.vlgmr.msra.gmra.mxu2 %v386_v9 }
 0x142   : > { %v350_v10 = vpop.f32.mrf.mxu3 }
 0x143   : > { %v351_v11 = vadd.f32 %v700_v60, %v350_v10 }
 0x145   : > { %v364_v14 = vmax.f32 %v351_v11, 0.0 }
 0x14a   : > { %v352_v12 = vpop.f32.mrf.mxu3 }
 0x14b   : > { %v353_v13 = vadd.f32 %v700_v60, %v352_v12 }
 0x14d   : > { %v365_v15 = vmax.f32 %v353_v13, 0.0 }
 0x14f   : > { %v387_v16 = vpack.c.bf16 %v365_v15, %v364_v14 }
 0x151   : > { %460 = vmatmul.bf16.gmra.mxu2 %v387_v16 }
 0x152   : > { %v355_v17 = vpop.f32.mrf.mxu3 }
 0x153   : > { %v356_v18 = vadd.f32 %v700_v60, %v355_v17 }
 0x155   : > { %v366_v21 = vmax.f32 %v356_v18, 0.0 }
 0x15a   : > { %v357_v19 = vpop.f32.mrf.mxu3 }
 0x15b   : > { %v358_v20 = vadd.f32 %v700_v60, %v357_v19 }
 0x15d   : > { %v367_v22 = vmax.f32 %v358_v20, 0.0 }
 0x15f   : > { %v388_v23 = vpack.c.bf16 %v367_v22, %v366_v21 }
 0x161   : > { %465 = vmatmul.bf16.gmra.mxu2 %v388_v23 }
 0x1a8   : > { %v451_v25 = vpop.f32.mrf.mxu1 }
 0x1a9   : > { %v452_v26 = vadd.f32 %v701_v24, %v451_v25 }
 0x1ab   : > { %472 = vst.msk [vmem:[%s172_s13] sm:$0xff] %vm471_vm1, %v452_v26 }
 0x1b0   : > { %v453_v27 = vpop.f32.mrf.mxu1 }
 0x1b1   : > { %v454_v28 = vadd.f32 %v701_v24, %v453_v27 }
 0x1b3   : > { %473 = vst.msk [vmem:[%s172_s13 + $0x8] sm:$0xff] %vm471_vm1, %v454_v28 }
 0x1c4   : > { %v456_v29 = vpop.f32.mrf.mxu2 }
 0x1c5   : > { %v457_v30 = vadd.f32 %v701_v24, %v456_v29 }
 0x1c7   : > { %474 = vst.msk [vmem:[%s172_s13 + $0x10] sm:$0xff] %vm471_vm1, %v457_v30 }
 0x1cc   : > { %v458_v31 = vpop.f32.mrf.mxu2 }
 0x1cd   : > { %v459_v32 = vadd.f32 %v701_v24, %v458_v31 }
 0x1cf   : > { %475 = vst.msk [vmem:[%s172_s13 + $0x18] sm:$0xff] %vm471_vm1, %v459_v32 }
 0x1d4   : > { %v461_v33 = vpop.f32.mrf.mxu2 }
 0x1d5   : > { %v462_v34 = vadd.f32 %v701_v24, %v461_v33 }
 0x1d7   : > { %476 = vst.msk [vmem:[%s172_s13 + $0x20] sm:$0xff] %vm471_vm1, %v462_v34 }
 0x1dc   : > { %v463_v35 = vpop.f32.mrf.mxu2 }
 0x1dd   : > { %v464_v36 = vadd.f32 %v701_v24, %v463_v35 }
 0x1df   : > { %477 = vst.msk [vmem:[%s172_s13 + $0x28] sm:$0xff] %vm471_vm1, %v464_v36 }
 0x1e4   : > { %v466_v37 = vpop.f32.mrf.mxu2 }
 0x1e5   : > { %v467_v38 = vadd.f32 %v701_v24, %v466_v37 }
 0x1e7   : > { %478 = vst.msk [vmem:[%s172_s13 + $0x30] sm:$0xff] %vm471_vm1, %v467_v38 }
 0x1ec   : > { %v468_v39 = vpop.f32.mrf.mxu2 }
 0x1ed   : > { %v469_v40 = vadd.f32 %v701_v24, %v468_v39 }
 0x1ef   : > { %479 = vst.msk [vmem:[%s172_s13 + $0x38] sm:$0xff] %vm471_vm1, %v469_v40 }
 0x1f0 PF: > { %s13_s12 = sadd.s32 1, %s708_s12  }
 0x1f1   : > { %p10_p4 = scmp.ge.s32.totalorder %s13_s12, 6  }
 0x1f3   :  { %12 = sbr.rel (!%p10_p4) target bundleno = 1 (0x1), region = 66 }

</bundles_post_ra>
